<compile_context>
chip_gen: v7x
topology: tpu7x:2x2x1
jax: 0.10.0
libtpu: 0.0.40
codegen_flags: <defaults>
</compile_context>

<pallas_src>
import functools
from math import ceil

import jax
import jax.numpy as jnp
from jax.experimental import pallas as pl
from jax.experimental.pallas import tpu as pltpu


def _soft_hist_kernel(x_ref, e_ref, o_ref, *, half_sigma, block_n,
                      chunks_per_split, n_total, needs_mask):
    p = pl.program_id(0)          # parallel split index
    k = pl.program_id(1)          # reduction (N-chunk) index

    # Zero this split's resident accumulator on its first reduction step.
    @pl.when(k == 0)
    def _():
        o_ref[...] = jnp.zeros_like(o_ref)

    x = x_ref[...]                                   # (1, TN)
    if needs_mask:
        # Lanes past the true length N read unspecified data (grid-padded tail
        # of the last block). Push them to +huge: tanh saturates to exactly 1.0
        # for every edge, so the per-bin finite difference cancels to 0.
        start = (p * chunks_per_split + k) * block_n
        lane = jax.lax.broadcasted_iota(jnp.int32, x.shape, 1)
        x = jnp.where((start + lane) < n_total, x, jnp.float32(1e30))

    # (1, TN) - (E, 1) broadcast -> (E, TN), E = bins + 1 edges (pre-scaled).
    t = half_sigma * x - e_ref[...]
    u = jnp.tanh(t)

    # Reduce over the lane (N) axis and accumulate into (1, E, 1).
    o_ref[...] += jnp.sum(u, axis=1, keepdims=True)[None]


def _choose_block_n(n, n_edges, max_block_n, vmem_budget_bytes):
    """Largest N-tile such that the (n_edges, block_n) f32 temporaries fit VMEM."""
    rows = ((n_edges + 7) // 8) * 8               # sublane-padded row count
    # ~4 live (rows, block_n) f32 intermediates -> 16 * rows * block_n bytes.
    cap = vmem_budget_bytes // (16 * max(rows, 8))
    cap = min(cap, max_block_n)
    cap = max((cap // 128) * 128, 128)            # lane-aligned tile
    if n <= cap:
        return n                                   # single full block
    return cap


def soft_histogram(x, *, binsize, vmin, vmax, sigma=3 * 50,
                   max_block_n=32768, vmem_budget_bytes=16 * 1024 * 1024):
    """Pallas TPU implementation of SoftHistogram.forward for a 1-D input x."""
    assert x.ndim == 1, "SoftHistogram forward expects a 1-D tensor"
    x = x.astype(jnp.float32)

    bins = ceil((vmax - vmin) / binsize)
    n_edges = bins + 1
    half_sigma = 0.5 * float(sigma)

    # Bin edges e_j = min + j*binsize, pre-scaled by sigma/2 (only bins+1
    # elements — the full x array is NOT pre-scaled).
    edges = float(vmin) + float(binsize) * jnp.arange(n_edges, dtype=jnp.float32)
    e_scaled = (half_sigma * edges).reshape(n_edges, 1)      # (E, 1) sublanes

    n = x.shape[0]
    block_n = _choose_block_n(n, n_edges, max_block_n, vmem_budget_bytes)
    num_chunks = -(-n // block_n)                  # cdiv
    # Parallel split over chunk groups (lets v7x megacore shard the work).
    # Only when it divides evenly, so every block index stays in range.
    P = 2 if (num_chunks >= 2 and num_chunks % 2 == 0) else 1
    K = num_chunks // P
    needs_mask = (num_chunks * block_n != n)

    x2 = x.reshape(1, n)                           # (1, N) -- N along lanes

    kernel = functools.partial(
        _soft_hist_kernel, half_sigma=half_sigma, block_n=block_n,
        chunks_per_split=K, n_total=n, needs_mask=needs_mask)

    u_part = pl.pallas_call(
        kernel,
        out_shape=jax.ShapeDtypeStruct((P, n_edges, 1), jnp.float32),
        grid_spec=pltpu.PrefetchScalarGridSpec(
            num_scalar_prefetch=0,
            grid=(P, K),
            in_specs=[
                # x chunk: block index along N = p*K + k
                pl.BlockSpec((1, block_n), lambda p, k: (0, p * K + k)),
                # pre-scaled edges: resident across the whole grid
                pl.BlockSpec((n_edges, 1), lambda p, k: (0, 0)),
            ],
            # Per-split resident accumulator (re-used across the k axis).
            out_specs=pl.BlockSpec((1, n_edges, 1), lambda p, k: (p, 0, 0)),
        ),
        compiler_params=pltpu.CompilerParams(
            dimension_semantics=("parallel", "arbitrary"),
            vmem_limit_bytes=32 * 1024 * 1024,
        ),
    )(x2, e_scaled)

    # Combine split partials (free when P == 1) and take the bin difference:
    #   out[i] = 0.5 * (U_i - U_{i+1})
    u = u_part.sum(axis=0).reshape(n_edges)
    return 0.5 * (u[:-1] - u[1:])


def _soft_histogram_ref(x, *, binsize, vmin, vmax, sigma=3 * 50):
    bins = ceil((vmax - vmin) / binsize)
    centers = (float(vmin)
               + float(binsize) * (jnp.arange(bins, dtype=jnp.float32) + 0.5))
    d = x[None, :].astype(jnp.float32) - centers[:, None]
    y = (jax.nn.sigmoid(sigma * (d + binsize / 2))
         - jax.nn.sigmoid(sigma * (d - binsize / 2)))
    return y.sum(axis=1)


if __name__ == "__main__":
    # Deterministic module parameters (from __init__ signature):
    binsize, vmin, vmax, sigma = 0.25, -1.0, 1.0, 3 * 50   # bins = 8
    bins = ceil((vmax - vmin) / binsize)

    key = jax.random.PRNGKey(0)
    k1, k2 = jax.random.split(key)

    # Case 1: small input -> single full-array block, single grid step.
    n1 = 1000
    x1 = jax.random.uniform(k1, (n1,), dtype=jnp.float32,
                            minval=vmin, maxval=vmax)
    out1 = jax.block_until_ready(
        soft_histogram(x1, binsize=binsize, vmin=vmin, vmax=vmax, sigma=sigma))
    ref1 = _soft_histogram_ref(x1, binsize=binsize, vmin=vmin, vmax=vmax,
                               sigma=sigma)
    assert out1.shape == (bins,)
    assert jnp.allclose(out1, ref1, rtol=1e-5, atol=2e-3), (out1, ref1)

    # Case 2: multi-block path (tiny forced tile) exercising the parallel
    # split (P=2), cross-step accumulation and the masked tail block.
    n2 = 5000
    x2 = jax.random.uniform(k2, (n2,), dtype=jnp.float32,
                            minval=vmin, maxval=vmax)
    out2 = jax.block_until_ready(
        soft_histogram(x2, binsize=binsize, vmin=vmin, vmax=vmax, sigma=sigma,
                       max_block_n=1280))
    ref2 = _soft_histogram_ref(x2, binsize=binsize, vmin=vmin, vmax=vmax,
                               sigma=sigma)
    assert out2.shape == (bins,)
    assert jnp.allclose(out2, ref2, rtol=1e-5, atol=2e-3), (out2, ref2)

    print("KERNEL_OK")
</pallas_src>

<mosaic_0001>
module attributes {stable_mosaic.version = 11 : i64} {
  func.func @_soft_hist_kernel(%arg0: i32, %arg1: i32, %arg2: memref<1x1000xf32, #tpu.memory_space<vmem>>, %arg3: memref<9x1xf32, #tpu.memory_space<vmem>>, %arg4: memref<1x9x1xf32, #tpu.memory_space<vmem>>) attributes {dimension_semantics = [#tpu.dimension_semantics<parallel>, #tpu.dimension_semantics<arbitrary>], iteration_bounds = array<i64: 1, 1>, scalar_prefetch = 0 : i64, scratch_operands = 0 : i64, tpu.core_type = #tpu.core_type<tc>, window_params = [{transform_indices = @transform_0, window_bounds = array<i64: 1, 1000>}, {pipeline_mode = #tpu.pipeline_mode<synchronous>, transform_indices = @transform_1, window_bounds = array<i64: 9, 1>}, {transform_indices = @transform_2, window_bounds = array<i64: 1, 9, 1>}]} {
    %c0_i32 = arith.constant 0 : i32
    %0 = arith.cmpi eq, %arg1, %c0_i32 : i32
    %1 = arith.extui %0 : i1 to i32
    %c0_i32_0 = arith.constant 0 : i32
    %2 = arith.cmpi ne, %1, %c0_i32_0 : i32
    scf.if %2 {
      %cst_11 = arith.constant 0.000000e+00 : f32
      %17 = vector.broadcast %cst_11 : f32 to vector<1x9x1xf32>
      %c0_12 = arith.constant 0 : index
      %c0_13 = arith.constant 0 : index
      %c0_14 = arith.constant 0 : index
      %18 = vector.load %arg4[%c0_12, %c0_13, %c0_14] : memref<1x9x1xf32, #tpu.memory_space<vmem>>, vector<1x9x1xf32>
      tpu.vector_store %arg4[%c0_12, %c0_13, %c0_14], %17 {strides = array<i32>} : memref<1x9x1xf32, #tpu.memory_space<vmem>>, vector<1x9x1xf32>,
    } else {
    }
    %c0 = arith.constant 0 : index
    %c0_1 = arith.constant 0 : index
    %3 = vector.load %arg2[%c0, %c0_1] : memref<1x1000xf32, #tpu.memory_space<vmem>>, vector<1x1000xf32>
    %cst = arith.constant 7.500000e+01 : f32
    %4 = vector.broadcast %cst : f32 to vector<1x1000xf32>
    %5 = arith.mulf %4, %3 : vector<1x1000xf32>
    %c0_2 = arith.constant 0 : index
    %c0_3 = arith.constant 0 : index
    %6 = vector.load %arg3[%c0_2, %c0_3] : memref<9x1xf32, #tpu.memory_space<vmem>>, vector<9x1xf32>
    %7 = vector.broadcast %5 : vector<1x1000xf32> to vector<9x1000xf32>
    %8 = vector.broadcast %6 : vector<9x1xf32> to vector<9x1000xf32>
    %9 = arith.subf %7, %8 : vector<9x1000xf32>
    %10 = math.tanh %9 : vector<9x1000xf32>
    %c0_4 = arith.constant 0 : index
    %c0_5 = arith.constant 0 : index
    %c0_6 = arith.constant 0 : index
    %11 = vector.load %arg4[%c0_4, %c0_5, %c0_6] : memref<1x9x1xf32, #tpu.memory_space<vmem>>, vector<1x9x1xf32>
    %cst_7 = arith.constant dense<0.000000e+00> : vector<9xf32>
    %12 = vector.multi_reduction <add>, %10, %cst_7 [1] : vector<9x1000xf32> to vector<9xf32>
    %13 = vector.shape_cast %12 : vector<9xf32> to vector<9x1xf32>
    %14 = vector.shape_cast %13 : vector<9x1xf32> to vector<1x9x1xf32>
    %15 = arith.addf %11, %14 : vector<1x9x1xf32>
    %c0_8 = arith.constant 0 : index
    %c0_9 = arith.constant 0 : index
    %c0_10 = arith.constant 0 : index
    %16 = vector.load %arg4[%c0_8, %c0_9, %c0_10] : memref<1x9x1xf32, #tpu.memory_space<vmem>>, vector<1x9x1xf32>
    tpu.vector_store %arg4[%c0_8, %c0_9, %c0_10], %15 {strides = array<i32>} : memref<1x9x1xf32, #tpu.memory_space<vmem>>, vector<1x9x1xf32>,
    return
  }
  func.func @transform_0(%arg0: i32, %arg1: i32) -> (i32, i32) {
    %c1_i32 = arith.constant 1 : i32
    %0 = arith.muli %arg0, %c1_i32 : i32
    %1 = arith.addi %0, %arg1 : i32
    %c0_i32 = arith.constant 0 : i32
    %c0_i32_0 = arith.constant 0 : i32
    return %c0_i32, %1 : i32, i32
  }
  func.func @transform_1(%arg0: i32, %arg1: i32) -> (i32, i32) {
    %c0_i32 = arith.constant 0 : i32
    %c0_i32_0 = arith.constant 0 : i32
    %c0_i32_1 = arith.constant 0 : i32
    return %c0_i32, %c0_i32_0 : i32, i32
  }
  func.func @transform_2(%arg0: i32, %arg1: i32) -> (i32, i32, i32) {
    %c0_i32 = arith.constant 0 : i32
    %c0_i32_0 = arith.constant 0 : i32
    %c0_i32_1 = arith.constant 0 : i32
    return %arg0, %c0_i32, %c0_i32_0 : i32, i32, i32
  }
}

</mosaic_0001>

<bundles_post_ra>
// kernel: tpu_custom_call.1
= control target key start
LH: loop header
LB: loop body
LE: loop exit
PB: predicated region body
PF: predicated region fallthrough
CT: control target
= control target key end

     0   :  { %v205_v0 = vmov 0   ;;  %vm34_vm0 = vcmask 7168   ;;  %v206_v3 = vmov 0.0   ;;  %v43_v4 = vlaneseq  ;;  %s260_s1 = inlined_call_operand.vmem [shape: f32[9,1], index: 1, kind: input, shape index: {}]   ;;  %s261_s2 = inlined_call_operand.vmem [shape: f32[1,9,1], index: 2, kind: output, shape index: {}]   ;;  %s262_s0 = inlined_call_operand.vmem [shape: f32[1,1000], index: 0, kind: input, shape index: {}]  }
   0x1   :  { %172 = vset.pattern.permute.xlu0 %v205_v0  ;;  %v41_v1 = vld [vmem:[%s260_s1 + $0x8] sm:$0x1]  ;;  %v40_v2 = vld [vmem:[%s260_s1] sm:$0xff]  ;;  %35 = vst.msk [vmem:[%s261_s2] sm:$0xff] %vm34_vm0, %v206_v3  ;;  %vm138_vm1 = vcmask 1040384   ;;  %vm133_vm2 = vcmask 850944  }
   0x2   :  { %90 = vperm.xlu0 %172, %v41_v1   ;;  %v44_v5 = vshrl.u32 %v43_v4, 7  ;;  %v38_v6 = vld [vmem:[%s262_s0] sm:$0xff]  ;;  %vm152_vm3 = vcmask 843776   ;;  %vm36_vm4 = vcmask 0  }
   0x3   :  { %v39_v9 = vmul.f32 75.0, %v38_v6  ;;  %37 = vst.msk [vmem:[%s261_s2 + $0x8] sm:$0x1] %vm36_vm4, %v206_v3 }
   0x4   :  { %v45_v7 = vsub.s32 0, %v44_v5  ;;  %v49_v8 = vsub.s32 1, %v44_v5  ;;  %v53_v10 = vsub.s32 2, %v44_v5  ;;  %v57_v15 = vsub.s32 3, %v44_v5 }
   0x5   :  { %v61_v16 = vsub.s32 4, %v44_v5  ;;  %v65_v20 = vsub.s32 5, %v44_v5  ;;  %v69_v24 = vsub.s32 6, %v44_v5  ;;  %v73_v28 = vsub.s32 7, %v44_v5 }
   0x6   :  { %85 = vperm.xlu0 %172, %v40_v2   ;;  %v46_v11 = vrot.slane %v39_v9, %v45_v7  ;;  %v50_v12 = vrot.slane %v39_v9, %v49_v8  ;;  %v54_v13 = vrot.slane %v39_v9, %v53_v10  ;;  %v58_v22 = vrot.slane %v39_v9, %v57_v15 }
   0x7   :  { %v62_v23 = vrot.slane %v39_v9, %v61_v16  ;;  %v66_v31 = vrot.slane %v39_v9, %v65_v20  ;;  %v70_v33 = vrot.slane %v39_v9, %v69_v24  ;;  %v74_v34 = vrot.slane %v39_v9, %v73_v28 }
  0x81   :  { %v91_v14 = vpop.permute.xlu0 %90 }
  0x82   :  { %v101_v17 = vsub.f32 %v46_v11, %v91_v14  ;;  %v102_v18 = vsub.f32 %v50_v12, %v91_v14  ;;  %v103_v19 = vsub.f32 %v54_v13, %v91_v14  ;;  %v104_v32 = vsub.f32 %v58_v22, %v91_v14 }
  0x83   :  { %v105_v38 = vsub.f32 %v62_v23, %v91_v14  ;;  %v106_v40 = vsub.f32 %v66_v31, %v91_v14  ;;  %v107_v42 = vsub.f32 %v70_v33, %v91_v14  ;;  %v108_v48 = vsub.f32 %v74_v34, %v91_v14 }
  0x84   :  { %173 = vtanh.f32 %v101_v17 }
  0x85   :  { %v86_v21 = vpop.permute.xlu0 %85  ;;  %175 = vtanh.f32 %v102_v18  ;;  %v125_v18 = vld [vmem:[%s261_s2] sm:$0xff] }
  0x86   :  { %v93_v25 = vsub.f32 %v46_v11, %v86_v21  ;;  %v94_v26 = vsub.f32 %v50_v12, %v86_v21  ;;  %v95_v27 = vsub.f32 %v54_v13, %v86_v21  ;;  %v96_v29 = vsub.f32 %v58_v22, %v86_v21 }
  0x87   :  { %177 = vtanh.f32 %v103_v19  ;;  %v97_v30 = vsub.f32 %v62_v23, %v86_v21  ;;  %v98_v35 = vsub.f32 %v66_v31, %v86_v21  ;;  %v99_v36 = vsub.f32 %v70_v33, %v86_v21 }
  0x88   :  { %179 = vtanh.f32 %v93_v25  ;;  %v100_v37 = vsub.f32 %v74_v34, %v86_v21  ;;  %v126_v21 = vld [vmem:[%s261_s2 + $0x8] sm:$0x1] }
  0x89   :  { %181 = vtanh.f32 %v94_v26 }
  0x8a   :  { %183 = vtanh.f32 %v95_v27 }
  0x8b   :  { %185 = vtanh.f32 %v96_v29 }
  0x8c   :  { %187 = vtanh.f32 %v97_v30 }
  0x8d   :  { %189 = vtanh.f32 %v104_v32 }
  0x8e   :  { %v174_v39 = vpop.eup %173  ;;  %191 = vtanh.f32 %v98_v35 }
  0x8f   :  { %v176_v41 = vpop.eup %175  ;;  %193 = vtanh.f32 %v99_v36  ;;  %v139_v43 = vsel %vm138_vm1, %v174_v39, 0.0 }
  0x90   :  { %195 = vtanh.f32 %v100_v37  ;;  %v140_v44 = vsel %vm138_vm1, %v176_v41, 0.0 }
  0x91   :  { %v178_v45 = vpop.eup %177  ;;  %197 = vtanh.f32 %v105_v38  ;;  %v141_v46 = vadd.f32 %v140_v44, %v139_v43 }
  0x92   :  { %v180_v47 = vpop.eup %179  ;;  %199 = vtanh.f32 %v106_v40  ;;  %v142_v52 = vsel %vm138_vm1, %v178_v45, 0.0 }
  0x93   :  { %v182_v49 = vpop.eup %181  ;;  %201 = vtanh.f32 %v107_v42  ;;  %v143_v54 = vadd.f32 %v142_v52, %v141_v46 }
  0x94   :  { %v184_v50 = vpop.eup %183  ;;  %v127_v51 = vadd.f32 %v182_v49, %v180_v47  ;;  %203 = vtanh.f32 %v108_v48 }
  0x95   :  { %v186_v53 = vpop.eup %185 }
  0x96   :  { %v188_v55 = vpop.eup %187  ;;  %v128_v56 = vadd.f32 %v184_v50, %v127_v51 }
  0x97   :  { %v190_v57 = vpop.eup %189 }
  0x98   :  { %v192_v58 = vpop.eup %191  ;;  %v129_v59 = vadd.f32 %v186_v53, %v128_v56  ;;  %v144_v60 = vsel %vm138_vm1, %v190_v57, 0.0 }
  0x99   :  { %v194_v61 = vpop.eup %193  ;;  %v145_v62 = vadd.f32 %v144_v60, %v143_v54 }
  0x9a   :  { %v196_v63 = vpop.eup %195  ;;  %v130_v0 = vadd.f32 %v188_v55, %v129_v59 }
  0x9b   :  { %v198_v1 = vpop.eup %197  ;;  %v134_v10 = vsel %vm133_vm2, %v196_v63, 0.0 }
  0x9c   :  { %v200_v2 = vpop.eup %199  ;;  %v131_v4 = vadd.f32 %v192_v58, %v130_v0  ;;  %v146_v5 = vsel %vm138_vm1, %v198_v1, 0.0 }
  0x9d   :  { %v202_v6 = vpop.eup %201  ;;  %v147_v7 = vadd.f32 %v146_v5, %v145_v62  ;;  %v148_v9 = vsel %vm138_vm1, %v200_v2, 0.0 }
  0x9e   :  { %v132_v8 = vadd.f32 %v194_v61, %v131_v4  ;;  %v204_v12 = vpop.eup %203  ;;  %v150_v14 = vsel %vm138_vm1, %v202_v6, 0.0 }
  0x9f   :  { %v149_v11 = vadd.f32 %v148_v9, %v147_v7  ;;  %v153_v16 = vsel %vm152_vm3, %v204_v12, 0.0 }
  0xa0   :  { %v135_v13 = vadd.f32 %v134_v10, %v132_v8 }
  0xa1   :  { %v151_v15 = vadd.f32 %v150_v14, %v149_v11 }
  0xa2   :  { %136 = vadd.xlane.f32.xlu1 %v135_v13 }
  0xa3   :  { %v154_v17 = vadd.f32 %v153_v16, %v151_v15 }
  0xa6   :  { %155 = vadd.xlane.f32.xlu1 %v154_v17 }
 0x12f   :  { %v137_v19 = vpop.xlane.xlu1 %136 }
 0x130   :  { %v157_v20 = vadd.f32 %v137_v19, %v125_v18 }
 0x132   :  { %160 = vst.msk [vmem:[%s261_s2] sm:$0xff] %vm34_vm0, %v157_v20 }
 0x133   :  { %v156_v22 = vpop.xlane.xlu1 %155 }
 0x134   :  { %v158_v23 = vadd.f32 %v156_v22, %v126_v21 }
 0x136   :  { %162 = vst.msk [vmem:[%s261_s2 + $0x8] sm:$0x1] %vm36_vm4, %v158_v23 }

</bundles_post_ra>
